<compile_context>
chip_gen: v5e
topology: v5e:2x2
jax: 0.10.0
libtpu: 0.0.40
codegen_flags: <defaults>
</compile_context>

<pallas_src>
import functools

import jax
import jax.numpy as jnp
from jax.experimental import pallas as pl
from jax.experimental.pallas import tpu as pltpu

EMB = 64                      # self.emb_size
N_LAYERS = 3                  # head_num
PROP_DTYPE = jnp.bfloat16     # dtype of the A_hat @ ego propagation matmul


# ---------------------------------------------------------------------------
# Fused Pallas kernel: all N_LAYERS propagation layers in one call
# ---------------------------------------------------------------------------
def ngcf_fused_kernel(adj_ref, ego0_ref, w_ref, b_ref, out_ref, ego_buf):
    """grid = (layer k, row-tile m).

    side  = A_hat[tile] @ ego_full                    (MXU, bf16 in / f32 acc)
    pre   = [side, ego*side] @ [W_gc; W_bi] + (b_gc+b_bi)   (one K=128 matmul)
    ego'  = LeakyReLU(pre, 0.2)       -> ping-pong VMEM scratch (next layer)
    norm  = ego' * rsqrt(max(||ego'||^2, 1e-24))      (== F.normalize(p=2,dim=1))
    out[:, (k+1)*64:(k+2)*64] = norm  ;  out[:, 0:64] = ego0 (at layer 0)
    """
    k = pl.program_id(0)                 # layer index
    m = pl.program_id(1)                 # row-tile index
    tm = adj_ref.shape[0]                # rows per tile
    n = ego0_ref.shape[0]                # total nodes (n_user + n_item)

    row0 = pl.multiple_of(m * tm, 8)

    # First grid step: load initial embeddings into ping-pong slot 0.
    @pl.when((k == 0) & (m == 0))
    def _():
        ego_buf[0:n, :] = ego0_ref[...]

    cur = jax.lax.rem(k, 2)
    base_cur = pl.multiple_of(cur * n, 8)
    base_nxt = pl.multiple_of((1 - cur) * n, 8)

    adj = adj_ref[...]                                        # (tm, n) bf16
    ego_full = ego_buf[pl.ds(base_cur, n), :]                 # (n, EMB) f32
    ego_tile = ego_buf[pl.ds(pl.multiple_of(base_cur + row0, 8), tm), :]

    # Graph propagation (dense stand-in for torch.sparse.mm), bf16 MXU path.
    side = jnp.dot(adj, ego_full.astype(adj.dtype),
                   preferred_element_type=jnp.float32)        # (tm, EMB) f32

    # Fused projection: one K=128 matmul replaces the two K=64 matmuls.
    x = jnp.concatenate([side, ego_tile * side], axis=-1)     # (tm, 2*EMB)
    pre = jnp.dot(x, w_ref[...],
                  preferred_element_type=jnp.float32) + b_ref[...]

    ego_new = jnp.where(pre > 0, pre, 0.2 * pre)              # LeakyReLU(0.2)
    # Ego for the next layer goes to the other ping-pong slot.
    ego_buf[pl.ds(pl.multiple_of(base_nxt + row0, 8), tm), :] = ego_new

    # F.normalize(p=2, dim=1): x / max(||x||, 1e-12) == x * rsqrt(max(||x||^2, 1e-24))
    ssq = jnp.sum(ego_new * ego_new, axis=-1, keepdims=True)
    norm = ego_new * jax.lax.rsqrt(jnp.maximum(ssq, 1e-24))

    # Lane-offset (static) writes into the resident (N, 4*EMB) output slab.
    for layer in range(N_LAYERS):
        @pl.when(k == layer)
        def _(layer=layer):
            if layer == 0:
                # ego0 columns + layer-0 norm in one 128-wide store.
                blk = jnp.concatenate(
                    [ego0_ref[pl.ds(row0, tm), :], norm], axis=-1)
                out_ref[pl.ds(row0, tm), 0:2 * EMB] = blk
            else:
                lo = (layer + 1) * EMB
                out_ref[pl.ds(row0, tm), lo:lo + EMB] = norm


# ---------------------------------------------------------------------------
# Wrappers
# ---------------------------------------------------------------------------
def _pick_row_tile(n):
    if n <= 512:
        return n
    for t in (512, 256, 128, 64, 32, 16, 8):
        if n % t == 0:
            return t
    return n


def ngcf_all_embeddings(adj, ego0, w_all, b_all):
    """Run the fused kernel; returns the (N, 4*EMB) all-embeddings slab."""
    n, d = ego0.shape
    assert d == EMB and adj.shape == (n, n)
    assert n % 8 == 0, "pad n_user + n_item to a multiple of 8"
    tm = _pick_row_tile(n)
    grid = (N_LAYERS, n // tm)
    out_dim = (N_LAYERS + 1) * EMB

    fn = pl.pallas_call(
        ngcf_fused_kernel,
        out_shape=jax.ShapeDtypeStruct((n, out_dim), jnp.float32),
        grid_spec=pltpu.PrefetchScalarGridSpec(
            num_scalar_prefetch=0,
            grid=grid,
            in_specs=[
                # adjacency row tile (streamed / double-buffered per layer)
                pl.BlockSpec((tm, n), lambda k, m: (m, 0)),
                # initial embeddings: constant index map -> resident, one DMA
                pl.BlockSpec((n, EMB), lambda k, m: (0, 0)),
                # per-layer stacked weights / biases, selected by layer index
                pl.BlockSpec((None, 2 * EMB, EMB), lambda k, m: (k, 0, 0)),
                pl.BlockSpec((None, 1, EMB), lambda k, m: (k, 0, 0)),
            ],
            # (N, 4*EMB) lane-dense output slab, resident across the whole grid
            out_specs=pl.BlockSpec((n, out_dim), lambda k, m: (0, 0)),
            # ping-pong ego buffer: rows [0:n) = slot 0, [n:2n) = slot 1
            scratch_shapes=[pltpu.VMEM((2 * n, EMB), jnp.float32)],
        ),
        compiler_params=pltpu.CompilerParams(
            # Layer k+1 row tiles read the full ego produced by layer k via the
            # VMEM scratch, so the row axis cannot be megacore-"parallel".
            dimension_semantics=("arbitrary", "arbitrary")),
    )
    return fn(adj.astype(PROP_DTYPE), ego0, w_all, b_all)


@functools.partial(jax.jit, static_argnames=("n_user",))
def ngcf_forward(adj, user_emb, item_emb, w_all, b_all, w_pred, b_pred,
                 users, items, *, n_user):
    """Full NGCF.forward (eval-mode, no dropout)."""
    ego0 = jnp.concatenate([user_emb, item_emb], axis=0)          # (N, 64)
    all_embs = ngcf_all_embeddings(adj, ego0, w_all, b_all)       # (N, 256)

    u_g = jnp.take(all_embs[:n_user], users, axis=0)              # (B, 256)
    i_g = jnp.take(all_embs[n_user:], items, axis=0)              # (B, 256)
    # Prediction head on B rows is tiny; a (B,1) Pallas output would be
    # lane-sparse and launch-overhead bound, so it stays in plain JAX.
    # TODO(synk): for large B, scalar-prefetch users/items and fuse the
    # gather + predict into the kernel above.
    logits = (u_g * i_g) @ w_pred + b_pred
    return jax.nn.sigmoid(logits.reshape(-1))                     # (B,)


def stack_layer_weights(gc_weights, bi_weights):
    """Stack per-layer weights for the fused K=128 matmul."""
    w_all = jnp.stack([
        jnp.concatenate([gc_weights[k][0], bi_weights[k][0]], axis=0)
        for k in range(N_LAYERS)])                                # (L, 128, 64)
    b_all = jnp.stack([gc_weights[k][1] + bi_weights[k][1]
                       for k in range(N_LAYERS)])                 # (L, 1, 64)
    return w_all, b_all


# ---------------------------------------------------------------------------
# Deterministic parameter / input construction + references
# ---------------------------------------------------------------------------
def xavier_uniform(key, shape):
    fan_in, fan_out = shape[0], shape[1]
    a = (6.0 / (fan_in + fan_out)) ** 0.5
    return jax.random.uniform(key, shape, jnp.float32, minval=-a, maxval=a)


def build_norm_adj(key, n_user, n_item):
    """Symmetric-normalized bipartite adjacency D^-1/2 A D^-1/2 (dense)."""
    r = (jax.random.uniform(key, (n_user, n_item)) < 0.15).astype(jnp.float32)
    n = n_user + n_item
    a = jnp.zeros((n, n), jnp.float32)
    a = a.at[:n_user, n_user:].set(r)
    a = a.at[n_user:, :n_user].set(r.T)
    deg = jnp.sum(a, axis=1)
    d_inv_sqrt = jnp.where(deg > 0, 1.0 / jnp.sqrt(jnp.maximum(deg, 1e-12)), 0.0)
    return a * d_inv_sqrt[:, None] * d_inv_sqrt[None, :]


def reference_forward_matched(adj, user_emb, item_emb, w_all, b_all,
                              w_pred, b_pred, users, items, n_user):
    """Pure-JAX mirror of the kernel math (bf16 propagation, fused matmul,
    rsqrt normalize) — tight-tolerance check."""
    ego = jnp.concatenate([user_emb, item_emb], 0)
    adj_c = adj.astype(PROP_DTYPE)
    all_embs = [ego]
    for k in range(N_LAYERS):
        side = jnp.dot(adj_c, ego.astype(PROP_DTYPE),
                       preferred_element_type=jnp.float32)
        x = jnp.concatenate([side, ego * side], axis=-1)
        pre = x @ w_all[k] + b_all[k]
        ego = jnp.where(pre > 0, pre, 0.2 * pre)
        ssq = jnp.sum(ego * ego, axis=1, keepdims=True)
        all_embs.append(ego * jax.lax.rsqrt(jnp.maximum(ssq, 1e-24)))
    all_embs = jnp.concatenate(all_embs, axis=1)
    u_g = jnp.take(all_embs[:n_user], users, axis=0)
    i_g = jnp.take(all_embs[n_user:], items, axis=0)
    logits = (u_g * i_g) @ w_pred + b_pred
    return jax.nn.sigmoid(logits.reshape(-1))


def reference_forward_f32(adj, user_emb, item_emb, gc_weights, bi_weights,
                          w_pred, b_pred, users, items, n_user):
    """PyTorch-faithful f32 eval-path reference (loose-tolerance sanity)."""
    ego = jnp.concatenate([user_emb, item_emb], 0)
    all_embs = [ego]
    for k in range(N_LAYERS):
        w_gc, b_gc = gc_weights[k]
        w_bi, b_bi = bi_weights[k]
        side = adj @ ego
        pre = side @ w_gc + b_gc + (ego * side) @ w_bi + b_bi
        ego = jnp.where(pre > 0, pre, 0.2 * pre)
        norm = ego / jnp.maximum(
            jnp.linalg.norm(ego, axis=1, keepdims=True), 1e-12)
        all_embs.append(norm)
    all_embs = jnp.concatenate(all_embs, axis=1)
    u_g = jnp.take(all_embs[:n_user], users, axis=0)
    i_g = jnp.take(all_embs[n_user:], items, axis=0)
    logits = (u_g * i_g) @ w_pred + b_pred
    return jax.nn.sigmoid(logits.reshape(-1))


if __name__ == "__main__":
    n_user, n_item = 24, 40           # N = 64
    batch = 8

    key = jax.random.PRNGKey(0)
    keys = jax.random.split(key, 16)

    norm_adj = build_norm_adj(keys[0], n_user, n_item)
    user_emb = xavier_uniform(keys[1], (n_user, EMB))
    item_emb = xavier_uniform(keys[2], (n_item, EMB))

    gc_weights, bi_weights = [], []
    for k in range(N_LAYERS):
        gc_weights.append((xavier_uniform(keys[3 + 2 * k], (EMB, EMB)),
                           xavier_uniform(keys[3 + 2 * k + 1], (1, EMB))))
        bi_weights.append((xavier_uniform(keys[9 + 2 * k], (EMB, EMB)),
                           xavier_uniform(keys[9 + 2 * k + 1], (1, EMB))))

    # predict_layer: nn.Linear(256, 1) -> store as (256, 1) weight, (1, 1) bias
    w_pred = xavier_uniform(keys[15], (4 * EMB, 1))
    b_pred = jnp.zeros((1, 1), jnp.float32)
    # NOTE: ME_layer from __init__ is unused in forward(), so it is omitted.

    w_all, b_all = stack_layer_weights(gc_weights, bi_weights)

    users = jnp.array([0, 3, 5, 7, 11, 13, 17, 23], dtype=jnp.int32)
    items = jnp.array([1, 2, 8, 9, 15, 20, 30, 39], dtype=jnp.int32)

    out = ngcf_forward(norm_adj, user_emb, item_emb, w_all, b_all,
                       w_pred, b_pred, users, items, n_user=n_user)
    out = jax.block_until_ready(out)

    ref_m = reference_forward_matched(norm_adj, user_emb, item_emb, w_all,
                                      b_all, w_pred, b_pred, users, items,
                                      n_user)
    ref_f = reference_forward_f32(norm_adj, user_emb, item_emb, gc_weights,
                                  bi_weights, w_pred, b_pred, users, items,
                                  n_user)

    assert out.shape == (batch,)
    # Tight check against the dtype-matched reference.
    assert jnp.allclose(out, ref_m, atol=1e-3, rtol=1e-3), (out, ref_m)
    # Loose sanity check against the f32 PyTorch-faithful math (bf16 propagation).
    assert jnp.allclose(out, ref_f, atol=5e-2), (out, ref_f)

    print("KERNEL_OK")
</pallas_src>

<mosaic_0001>
module attributes {stable_mosaic.version = 11 : i64} {
  func.func @ngcf_fused_kernel(%arg0: i32, %arg1: i32, %arg2: memref<64x64xbf16, #tpu.memory_space<vmem>>, %arg3: memref<64x64xf32, #tpu.memory_space<vmem>>, %arg4: memref<1x128x64xf32, #tpu.memory_space<vmem>>, %arg5: memref<1x1x64xf32, #tpu.memory_space<vmem>>, %arg6: memref<64x256xf32, #tpu.memory_space<vmem>>, %arg7: memref<128x64xf32, #tpu.memory_space<vmem>>) attributes {dimension_semantics = [#tpu.dimension_semantics<arbitrary>, #tpu.dimension_semantics<arbitrary>], iteration_bounds = array<i64: 3, 1>, scalar_prefetch = 0 : i64, scratch_operands = 1 : i64, tpu.core_type = #tpu.core_type<tc>, window_params = [{transform_indices = @transform_0, window_bounds = array<i64: 64, 64>}, {pipeline_mode = #tpu.pipeline_mode<synchronous>, transform_indices = @transform_1, window_bounds = array<i64: 64, 64>}, {transform_indices = @transform_2, window_bounds = array<i64: 1, 128, 64>}, {transform_indices = @transform_3, window_bounds = array<i64: 1, 1, 64>}, {pipeline_mode = #tpu.pipeline_mode<synchronous>, transform_indices = @transform_4, window_bounds = array<i64: 64, 256>}]} {
    %c64_i32 = arith.constant 64 : i32
    %0 = arith.muli %arg1, %c64_i32 : i32
    %1 = tpu.assume_multiple %0, 8 : i32
    %c0_i32 = arith.constant 0 : i32
    %2 = arith.cmpi eq, %arg0, %c0_i32 : i32
    %c0_i32_0 = arith.constant 0 : i32
    %3 = arith.cmpi eq, %arg1, %c0_i32_0 : i32
    %4 = arith.andi %2, %3 : i1
    %5 = arith.extui %4 : i1 to i32
    %c0_i32_1 = arith.constant 0 : i32
    %6 = arith.cmpi ne, %5, %c0_i32_1 : i32
    scf.if %6 {
      %c0_25 = arith.constant 0 : index
      %c0_26 = arith.constant 0 : index
      %57 = vector.load %arg3[%c0_25, %c0_26] : memref<64x64xf32, #tpu.memory_space<vmem>>, vector<64x64xf32>
      %c0_27 = arith.constant 0 : index
      %c0_28 = arith.constant 0 : index
      %58 = vector.load %arg7[%c0_27, %c0_28] : memref<128x64xf32, #tpu.memory_space<vmem>>, vector<64x64xf32>
      tpu.vector_store %arg7[%c0_27, %c0_28], %57 {strides = array<i32>} : memref<128x64xf32, #tpu.memory_space<vmem>>, vector<64x64xf32>,
    } else {
    }
    %c2_i32 = arith.constant 2 : i32
    %7 = arith.remsi %arg0, %c2_i32 : i32
    %c64_i32_2 = arith.constant 64 : i32
    %8 = arith.muli %7, %c64_i32_2 : i32
    %9 = tpu.assume_multiple %8, 8 : i32
    %c1_i32 = arith.constant 1 : i32
    %10 = arith.subi %c1_i32, %7 : i32
    %c64_i32_3 = arith.constant 64 : i32
    %11 = arith.muli %10, %c64_i32_3 : i32
    %12 = tpu.assume_multiple %11, 8 : i32
    %c0 = arith.constant 0 : index
    %c0_4 = arith.constant 0 : index
    %13 = vector.load %arg2[%c0, %c0_4] : memref<64x64xbf16, #tpu.memory_space<vmem>>, vector<64x64xbf16>
    %14 = arith.index_cast %9 : i32 to index
    %c0_5 = arith.constant 0 : index
    %15 = vector.load %arg7[%14, %c0_5] : memref<128x64xf32, #tpu.memory_space<vmem>>, vector<64x64xf32>
    %16 = arith.addi %9, %1 : i32
    %17 = tpu.assume_multiple %16, 8 : i32
    %18 = arith.index_cast %17 : i32 to index
    %c0_6 = arith.constant 0 : index
    %19 = vector.load %arg7[%18, %c0_6] : memref<128x64xf32, #tpu.memory_space<vmem>>, vector<64x64xf32>
    %20 = arith.truncf %15 : vector<64x64xf32> to vector<64x64xbf16>
    %cst = arith.constant dense<0.000000e+00> : vector<64x64xf32>
    %21 = tpu.matmul %13, %20, %cst {dimension_numbers = #tpu.dot_dimension_numbers<[1], [0], [0], [1], [0, 0, 1, 1], [], []>} : vector<64x64xbf16>, vector<64x64xbf16>, vector<64x64xf32> -> vector<64x64xf32>
    %22 = arith.mulf %19, %21 : vector<64x64xf32>
    %23 = tpu.concatenate %21, %22 in 1 : vector<64x64xf32>, vector<64x64xf32> -> vector<64x128xf32>
    %c0_7 = arith.constant 0 : index
    %c0_8 = arith.constant 0 : index
    %c0_9 = arith.constant 0 : index
    %24 = vector.load %arg4[%c0_7, %c0_8, %c0_9] : memref<1x128x64xf32, #tpu.memory_space<vmem>>, vector<1x128x64xf32>
    %25 = vector.shape_cast %24 : vector<1x128x64xf32> to vector<128x64xf32>
    %cst_10 = arith.constant dense<0.000000e+00> : vector<64x64xf32>
    %26 = tpu.matmul %23, %25, %cst_10 {dimension_numbers = #tpu.dot_dimension_numbers<[1], [0], [0], [1], [0, 0, 1, 1], [], []>} : vector<64x128xf32>, vector<128x64xf32>, vector<64x64xf32> -> vector<64x64xf32>
    %c0_11 = arith.constant 0 : index
    %c0_12 = arith.constant 0 : index
    %c0_13 = arith.constant 0 : index
    %27 = vector.load %arg5[%c0_11, %c0_12, %c0_13] : memref<1x1x64xf32, #tpu.memory_space<vmem>>, vector<1x1x64xf32>
    %28 = vector.shape_cast %27 : vector<1x1x64xf32> to vector<1x64xf32>
    %29 = vector.broadcast %28 : vector<1x64xf32> to vector<64x64xf32>
    %30 = arith.addf %26, %29 : vector<64x64xf32>
    %cst_14 = arith.constant 0.000000e+00 : f32
    %31 = vector.broadcast %cst_14 : f32 to vector<64x64xf32>
    %32 = arith.cmpf ogt, %30, %31 : vector<64x64xf32>
    %cst_15 = arith.constant 2.000000e-01 : f32
    %33 = vector.broadcast %cst_15 : f32 to vector<64x64xf32>
    %34 = arith.mulf %33, %30 : vector<64x64xf32>
    %35 = arith.select %32, %30, %34 : vector<64x64xi1>, vector<64x64xf32>
    %36 = arith.addi %12, %1 : i32
    %37 = tpu.assume_multiple %36, 8 : i32
    %38 = arith.index_cast %37 : i32 to index
    %c0_16 = arith.constant 0 : index
    %39 = vector.load %arg7[%38, %c0_16] : memref<128x64xf32, #tpu.memory_space<vmem>>, vector<64x64xf32>
    tpu.vector_store %arg7[%38, %c0_16], %35 {strides = array<i32>} : memref<128x64xf32, #tpu.memory_space<vmem>>, vector<64x64xf32>,
    %40 = arith.mulf %35, %35 : vector<64x64xf32>
    %cst_17 = arith.constant dense<0.000000e+00> : vector<64xf32>
    %41 = vector.multi_reduction <add>, %40, %cst_17 [1] : vector<64x64xf32> to vector<64xf32>
    %42 = vector.shape_cast %41 : vector<64xf32> to vector<64x1xf32>
    %cst_18 = arith.constant 1.000000e-24 : f32
    %43 = vector.broadcast %cst_18 : f32 to vector<64x1xf32>
    %44 = arith.maximumf %42, %43 : vector<64x1xf32>
    %45 = math.rsqrt %44 : vector<64x1xf32>
    %46 = vector.broadcast %45 : vector<64x1xf32> to vector<64x64xf32>
    %47 = arith.mulf %35, %46 : vector<64x64xf32>
    %c0_i32_19 = arith.constant 0 : i32
    %48 = arith.cmpi eq, %arg0, %c0_i32_19 : i32
    %49 = arith.extui %48 : i1 to i32
    %c0_i32_20 = arith.constant 0 : i32
    %50 = arith.cmpi ne, %49, %c0_i32_20 : i32
    scf.if %50 {
      %57 = arith.index_cast %1 : i32 to index
      %c0_25 = arith.constant 0 : index
      %58 = vector.load %arg3[%57, %c0_25] : memref<64x64xf32, #tpu.memory_space<vmem>>, vector<64x64xf32>
      %59 = tpu.concatenate %58, %47 in 1 : vector<64x64xf32>, vector<64x64xf32> -> vector<64x128xf32>
      %60 = arith.index_cast %1 : i32 to index
      %c0_26 = arith.constant 0 : index
      %61 = vector.load %arg6[%60, %c0_26] : memref<64x256xf32, #tpu.memory_space<vmem>>, vector<64x128xf32>
      tpu.vector_store %arg6[%60, %c0_26], %59 {strides = array<i32>} : memref<64x256xf32, #tpu.memory_space<vmem>>, vector<64x128xf32>,
    } else {
    }
    %c1_i32_21 = arith.constant 1 : i32
    %51 = arith.cmpi eq, %arg0, %c1_i32_21 : i32
    %52 = arith.extui %51 : i1 to i32
    %c0_i32_22 = arith.constant 0 : i32
    %53 = arith.cmpi ne, %52, %c0_i32_22 : i32
    scf.if %53 {
      %57 = arith.index_cast %1 : i32 to index
      %c128 = arith.constant 128 : index
      %58 = vector.load %arg6[%57, %c128] : memref<64x256xf32, #tpu.memory_space<vmem>>, vector<64x64xf32>
      tpu.vector_store %arg6[%57, %c128], %47 {strides = array<i32>} : memref<64x256xf32, #tpu.memory_space<vmem>>, vector<64x64xf32>,
    } else {
    }
    %c2_i32_23 = arith.constant 2 : i32
    %54 = arith.cmpi eq, %arg0, %c2_i32_23 : i32
    %55 = arith.extui %54 : i1 to i32
    %c0_i32_24 = arith.constant 0 : i32
    %56 = arith.cmpi ne, %55, %c0_i32_24 : i32
    scf.if %56 {
      %57 = arith.index_cast %1 : i32 to index
      %c192 = arith.constant 192 : index
      %58 = vector.load %arg6[%57, %c192] : memref<64x256xf32, #tpu.memory_space<vmem>>, vector<64x64xf32>
      tpu.vector_store %arg6[%57, %c192], %47 {strides = array<i32>} : memref<64x256xf32, #tpu.memory_space<vmem>>, vector<64x64xf32>,
    } else {
    }
    return
  }
  func.func @transform_0(%arg0: i32, %arg1: i32) -> (i32, i32) {
    %c0_i32 = arith.constant 0 : i32
    %c0_i32_0 = arith.constant 0 : i32
    return %arg1, %c0_i32 : i32, i32
  }
  func.func @transform_1(%arg0: i32, %arg1: i32) -> (i32, i32) {
    %c0_i32 = arith.constant 0 : i32
    %c0_i32_0 = arith.constant 0 : i32
    %c0_i32_1 = arith.constant 0 : i32
    return %c0_i32, %c0_i32_0 : i32, i32
  }
  func.func @transform_2(%arg0: i32, %arg1: i32) -> (i32, i32, i32) {
    %c0_i32 = arith.constant 0 : i32
    %c0_i32_0 = arith.constant 0 : i32
    %c0_i32_1 = arith.constant 0 : i32
    return %arg0, %c0_i32, %c0_i32_0 : i32, i32, i32
  }
  func.func @transform_3(%arg0: i32, %arg1: i32) -> (i32, i32, i32) {
    %c0_i32 = arith.constant 0 : i32
    %c0_i32_0 = arith.constant 0 : i32
    %c0_i32_1 = arith.constant 0 : i32
    return %arg0, %c0_i32, %c0_i32_0 : i32, i32, i32
  }
  func.func @transform_4(%arg0: i32, %arg1: i32) -> (i32, i32) {
    %c0_i32 = arith.constant 0 : i32
    %c0_i32_0 = arith.constant 0 : i32
    %c0_i32_1 = arith.constant 0 : i32
    return %c0_i32, %c0_i32_0 : i32, i32
  }
}

</mosaic_0001>

<bundles_post_ra>
// kernel: ngcf_forward.1
= control target key start
LH: loop header
LB: loop body
LE: loop exit
PB: predicated region body
PF: predicated region fallthrough
CT: control target
= control target key end

     0   :  { %s1029_s15 = smov 0   ;;  %s1031_s16 = smov 0   ;;  %s1427_s0 = inlined_call_operand.vmem [shape: bf16[64,64], index: 0, kind: input, shape index: {}]   ;;  %s1428_s1 = inlined_call_operand.vmem [shape: f32[64,64], index: 1, kind: input, shape index: {}]   ;;  %s1429_s2 = inlined_call_operand.vmem [shape: f32[3,128,64], index: 2, kind: input, shape index: {}]   ;;  %s1430_s3 = inlined_call_operand.vmem [shape: f32[3,1,64], index: 3, kind: input, shape index: {}]   ;;  %s1431_s4 = inlined_call_operand.vmem [shape: f32[64,256], index: 4, kind: output, shape index: {}]  }
   0x1   :  { %s1033_s17 = smov 0  }
   0x2 LB: > { %s26_s18 = sadd.s32 1, %s995_s16  ;;  %p844_p0 = scmp.ge.s32.totalorder %s999_s17, 1  ;;  %s999_s17 = sphi %s1033_s17, %s14_s17   ;;  %s995_s16 = sphi %s1031_s16, %s1433_s16   ;;  %s991_s15 = sphi %s1029_s15, %s1432_s15  }
   0x3   : > { %p28_p1 = scmp.ge.s32.totalorder %s26_s18, 3  ;;  %p188_p2 = scmp.lt.s32.totalorder %s999_s17, 4 }
   0x5   : > { %s1435_s18 = smov (%p28_p1, %s26_s18), 0  ;;  %p189_p3 = pnand %p844_p0, %p188_p2 }
   0x6   : > { %p223_p4 = scmp.lt.s32.totalorder (!%p189_p3), %s991_s15, 2  ;;  %p233_p5 = scmp.eq.s32.totalorder (!%p189_p3), %s991_s15, 0 }
   0x7   : > { %192 = sbr.rel (%p189_p3) target bundleno = 924 (0x39c), region = 36 }
   0xc   : > { %s1052_s19 = scalar_select %p223_p4, %s991_s15, 2  ;;  %v239_v0 = vld [vmem:[%s1428_s1] sm:$0xff] (%p233_p5)  ;;  %vm247_vm0 = vcmask (%p233_p5), 523264   ;;  %v240_v1 = vld [vmem:[%s1428_s1 + $0x8] sm:$0xff] (%p233_p5)  ;;  %v241_v2 = vld [vmem:[%s1428_s1 + $0x10] sm:$0xff] (%p233_p5) }
   0xd   : > { %238 = sbr.rel (!%p233_p5) target bundleno = 21 (0x15), region = 40  ;;  %248 = vst.msk [vmem:[#allocation2] sm:$0xff] (%p233_p5), %vm247_vm0, %v239_v0  ;;  %v242_v3 = vld [vmem:[%s1428_s1 + $0x18] sm:$0xff] (%p233_p5)  ;;  %v243_v4 = vld [vmem:[%s1428_s1 + $0x20] sm:$0xff] (%p233_p5)  ;;  %v244_v5 = vld [vmem:[%s1428_s1 + $0x28] sm:$0xff] (%p233_p5) }
   0xe   : > { %s876_s20 = sshll.u32 %s1052_s19, 7  ;;  %s230_s23 = scalar_lea.vmem %s1430_s3, %s1052_s19  ;;  %249 = vst.msk [vmem:[#allocation2 + $0x8] sm:$0xff] (%p233_p5), %vm247_vm0, %v240_v1  ;;  %v245_v6 = vld [vmem:[%s1428_s1 + $0x30] sm:$0xff] (%p233_p5)  ;;  %v246_v7 = vld [vmem:[%s1428_s1 + $0x38] sm:$0xff] (%p233_p5) }
   0xf   : > { %s1062_s26 = scalar_lea.vmem %s1429_s2, %s876_s20  ;;  %250 = vst.msk [vmem:[#allocation2 + $0x10] sm:$0xff] (%p233_p5), %vm247_vm0, %v241_v2 }
  0x10   : > { %251 = vst.msk [vmem:[#allocation2 + $0x18] sm:$0xff] (%p233_p5), %vm247_vm0, %v242_v3 }
  0x11   : > { %252 = vst.msk [vmem:[#allocation2 + $0x20] sm:$0xff] (%p233_p5), %vm247_vm0, %v243_v4 }
  0x12   : > { %253 = vst.msk [vmem:[#allocation2 + $0x28] sm:$0xff] %vm247_vm0, %v244_v5 }
  0x13   : > { %254 = vst.msk [vmem:[#allocation2 + $0x30] sm:$0xff] %vm247_vm0, %v245_v6 }
  0x14   : > { %255 = vst.msk [vmem:[#allocation2 + $0x38] sm:$0xff] %vm247_vm0, %v246_v7 }
  0x15 PF: > { %p256_p6 = scmp.lt.s32.totalorder %s991_s15, 0  ;;  %s257_s22 = ssub.s32 0, %s991_s15  ;;  %v879_v20 = vld [vmem:[%s1427_s0 + $0x8] sm:$0xff]  ;;  %v878_v21 = vld [vmem:[%s1427_s0] sm:$0xff]  ;;  %vm316_vm1 = vcmask 523264   ;;  %v880_v22 = vld [vmem:[%s1427_s0 + $0x10] sm:$0xff] }
  0x16   : > { %s848_s24 = smin.u32 %s991_s15, %s257_s22  ;;  %v881_v23 = vld [vmem:[%s1427_s0 + $0x18] sm:$0xff]  ;;  %s1001_s12 = smov 64   ;;  %v420_v31 = vld [vmem:[%s1062_s26 + $0x70] sm:$0xff]  ;;  %v419_v32 = vld [vmem:[%s1062_s26 + $0x68] sm:$0xff] }
  0x17   : > { %s259_s25 = sand.u32 1, %s848_s24   ;;  %v421_v30 = vld [vmem:[%s1062_s26 + $0x78] sm:$0xff]  ;;  %v418_v35 = vld [vmem:[%s1062_s26 + $0x60] sm:$0xff]  ;;  %v416_v37 = vld [vmem:[%s1062_s26 + $0x50] sm:$0xff]  ;;  %p871_p7 = scmp.ne.s32.totalorder %s991_s15, 0 }
  0x18   : > { %s260_s27 = ssub.s32 0, %s259_s25  ;;  %887 = vmatpush.msra.mxu2 %v421_v30  ;;  %886 = vmatpush.msra.mxu1 %v421_v30  ;;  %v417_v36 = vld [vmem:[%s1062_s26 + $0x58] sm:$0xff]  ;;  %v415_v38 = vld [vmem:[%s1062_s26 + $0x48] sm:$0xff]  ;;  %v414_v41 = vld [vmem:[%s1062_s26 + $0x40] sm:$0xff]  ;;  %s1002_s19 = smov (!%p871_p7), 64  }
  0x19   : > { %s1437_s27 = smov (!%p256_p6, %s260_s27), %s259_s25  ;;  %v413_v42 = vld [vmem:[%s1062_s26 + $0x38] sm:$0xff]  ;;  %v412_v43 = vld [vmem:[%s1062_s26 + $0x30] sm:$0xff]  ;;  %v411_v45 = vld [vmem:[%s1062_s26 + $0x28] sm:$0xff] }
  0x1a   : > { %s849_s28 = sshll.u32 %s1437_s27, 6  ;;  %889 = vmatpush.msra.mxu2 %v420_v31  ;;  %888 = vmatpush.msra.mxu1 %v420_v31  ;;  %v410_v49 = vld [vmem:[%s1062_s26 + $0x20] sm:$0xff]  ;;  %v409_v51 = vld [vmem:[%s1062_s26 + $0x18] sm:$0xff]  ;;  %v408_v52 = vld [vmem:[%s1062_s26 + $0x10] sm:$0xff]  ;;  %s263_s14 = ssub.s32 1, %s1437_s27 }
  0x1b   : > { %s273_s29 = scalar_lea.vmem [#allocation2], %s849_s28  ;;  %v407_v57 = vld [vmem:[%s1062_s26 + $0x8] sm:$0xff]  ;;  %v406_v58 = vld [vmem:[%s1062_s26] sm:$0xff]  ;;  %s850_s20 = sshll.u32 %s263_s14, 6 }
  0x1c   : > { %v1094_v8 = vld [vmem:[%s273_s29 + $0x30] sm:$0xff]  ;;  %v1096_v9 = vld [vmem:[%s273_s29 + $0x38] sm:$0xff]  ;;  %v278_v10 = vld [vmem:[%s273_s29 + $0x20] sm:$0xff]  ;;  %891 = vmatpush.msra.mxu2 %v419_v32  ;;  %890 = vmatpush.msra.mxu1 %v419_v32  ;;  %s1185_s21 = scalar_lea.vmem [#allocation2], %s850_s20 }
  0x1d   : > { %v295_v11 = vpack.c.bf16 %v1096_v9, %v1094_v8  ;;  %v279_v12 = vld [vmem:[%s273_s29 + $0x28] sm:$0xff]  ;;  %v1100_v14 = vld [vmem:[%s273_s29 + $0x10] sm:$0xff]  ;;  %v277_v15 = vld [vmem:[%s273_s29 + $0x18] sm:$0xff] }
  0x1e   : > { %v294_v13 = vpack.c.bf16 %v279_v12, %v278_v10  ;;  %v293_v16 = vpack.c.bf16 %v277_v15, %v1100_v14  ;;  %v274_v17 = vld [vmem:[%s273_s29] sm:$0xff]  ;;  %v1103_v18 = vld [vmem:[%s273_s29 + $0x8] sm:$0xff]  ;;  %893 = vmatpush.msra.mxu2 %v418_v35  ;;  %892 = vmatpush.msra.mxu1 %v418_v35 }
  0x1f   : > { %882 = vmatpush.bf16.msra.mxu3 %v295_v11  ;;  %333 = vmatpush.bf16.msra.mxu0 %v295_v11  ;;  %v292_v19 = vpack.c.bf16 %v1103_v18, %v274_v17 }
  0x20   : > { %895 = vmatpush.msra.mxu2 %v417_v36  ;;  %894 = vmatpush.msra.mxu1 %v417_v36 }
  0x22   : > { %897 = vmatpush.msra.mxu2 %v416_v37  ;;  %896 = vmatpush.msra.mxu1 %v416_v37 }
  0x23   : > { %883 = vmatpush.bf16.msra.mxu3 %v294_v13  ;;  %334 = vmatpush.bf16.msra.mxu0 %v294_v13 }
  0x24   : > { %899 = vmatpush.msra.mxu2 %v415_v38  ;;  %898 = vmatpush.msra.mxu1 %v415_v38 }
  0x26   : > { %901 = vmatpush.msra.mxu2 %v414_v41  ;;  %900 = vmatpush.msra.mxu1 %v414_v41 }
  0x27   : > { %884 = vmatpush.bf16.msra.mxu3 %v293_v16  ;;  %335 = vmatpush.bf16.msra.mxu0 %v293_v16 }
  0x28   : > { %903 = vmatpush.msra.mxu2 %v413_v42  ;;  %902 = vmatpush.msra.mxu1 %v413_v42 }
  0x2a   : > { %905 = vmatpush.msra.mxu2 %v412_v43  ;;  %904 = vmatpush.msra.mxu1 %v412_v43 }
  0x2b   : > { %885 = vmatpush.bf16.msra.mxu3 %v292_v19  ;;  %336 = vmatpush.bf16.msra.mxu0 %v292_v19 }
  0x2c   : > { %907 = vmatpush.msra.mxu2 %v411_v45  ;;  %906 = vmatpush.msra.mxu1 %v411_v45 }
  0x2e   : > { %868 = vmatmul.msk.bf16.vlgmr.msra.gmra.mxu3 %vm316_vm1, %v879_v20  ;;  %867 = vmatmul.msk.bf16.vlgmr.msra.gmra.mxu0 %vm316_vm1, %v878_v21 }
  0x2f   : > { %426 = vmatpush.msrb.mxu0 %v421_v30  ;;  %909 = vmatpush.msra.mxu2 %v410_v49 }
  0x30   : > { %908 = vmatpush.msra.mxu1 %v410_v49 }
  0x31   : > { %427 = vmatpush.msrb.mxu0 %v420_v31  ;;  %911 = vmatpush.msra.mxu2 %v409_v51 }
  0x32   : > { %910 = vmatpush.msra.mxu1 %v409_v51 }
  0x33   : > { %428 = vmatpush.msrb.mxu0 %v419_v32  ;;  %913 = vmatpush.msra.mxu2 %v408_v52 }
  0x34   : > { %912 = vmatpush.msra.mxu1 %v408_v52 }
  0x35   : > { %429 = vmatpush.msrb.mxu0 %v418_v35  ;;  %915 = vmatpush.msra.mxu2 %v407_v57 }
  0x36   : > { %914 = vmatpush.msra.mxu1 %v407_v57 }
  0x37   : > { %430 = vmatpush.msrb.mxu0 %v417_v36  ;;  %917 = vmatpush.msra.mxu2 %v406_v58 }
  0x38   : > { %916 = vmatpush.msra.mxu1 %v406_v58 }
  0x39   : > { %431 = vmatpush.msrb.mxu0 %v416_v37 }
  0x3b   : > { %432 = vmatpush.msrb.mxu0 %v415_v38 }
  0x3d   : > { %433 = vmatpush.msrb.mxu0 %v414_v41 }
  0x3e   : > { %869 = vmatmul.msk.bf16.gmra.mxu3 %vm316_vm1, %v880_v22 }
  0x3f   : > { %434 = vmatpush.msrb.mxu0 %v413_v42 }
  0x41   : > { %435 = vmatpush.msrb.mxu0 %v412_v43 }
  0x43   : > { %436 = vmatpush.msrb.mxu0 %v411_v45 }
  0x45   : > { %437 = vmatpush.msrb.mxu0 %v410_v49 }
  0x47   : > { %438 = vmatpush.msrb.mxu0 %v409_v51 }
  0x49   : > { %439 = vmatpush.msrb.mxu0 %v408_v52 }
  0x4b   : > { %440 = vmatpush.msrb.mxu0 %v407_v57 }
  0x4d   : > { %441 = vmatpush.msrb.mxu0 %v406_v58 }
  0x4e   : > { %870 = vmatmul.msk.bf16.gmra.mxu3 %vm316_vm1, %v881_v23 }
  0xab   : > { %v1124_v25 = vpop.f32.mrf.mxu0 }
  0xac   : > { %v358_v26 = vmul.f32 %v1124_v25, %v274_v17 }
  0xb1   : > { %v1122_v24 = vpop.f32.mrf.mxu3 }
  0xb2   : > { %v360_v54 = vmul.f32 %v1122_v24, %v1100_v14  ;;  %v960_v14 = vld [vmem:[%s230_s23] ss:$0 sm:$0xff] }
  0xb3   : > { %v340_v44 = vpop.f32.mrf.mxu0 }
  0xb4   : > { %v359_v47 = vmul.f32 %v340_v44, %v1103_v18 }
  0xb9   : > { %v1127_v27 = vpop.f32.mrf.mxu3 }
  0xba   : > { %v361_v28 = vmul.f32 %v1127_v27, %v277_v15 }
  0xbc   : > { %v955_v29 = vpack.i.bf16 %v361_v28, %v358_v26 }
  0xbe   : > { %956 = vrot.lane.b32.xlu2 %v955_v29, %s1001_s12 }
  0xc1   : > { %v1134_v33 = vpop.f32.mrf.mxu3 }
  0xc2   : > { %v362_v34 = vmul.f32 %v1134_v33, %v278_v10 }
  0xc4   : > { %382 = vrot.lane.b32.xlu0 %v362_v34, %s1001_s12 }
  0xc9   : > { %v1142_v39 = vpop.f32.mrf.mxu3 }
  0xca   : > { %v363_v40 = vmul.f32 %v1142_v39, %v279_v12 }
  0xcc   : > { %384 = vrot.lane.b32.xlu0 %v363_v40, %s1001_s12 }
  0xd1   : > { %v353_v46 = vpop.f32.mrf.mxu3 }
  0xd2   : > { %v364_v48 = vmul.f32 %v353_v46, %v1094_v8 }
  0xd4   : > { %v945_v50 = vpack.i.bf16 %v364_v48, %v359_v47 }
  0xd6   : > { %946 = vrot.lane.b32.xlu1 %v945_v50, %s1001_s12 }
  0xd9   : > { %v355_v53 = vpop.f32.mrf.mxu3 }
  0xda   : > { %v365_v55 = vmul.f32 %v355_v53, %v1096_v9 }
  0xdc   : > { %v950_v56 = vpack.i.bf16 %v365_v55, %v360_v54 }
  0xde   : > { %951 = vrot.lane.b32.xlu1 %v950_v56, %s1001_s12 }
 0x118   : > { %v957_v59 = vpop.permute.xlu2 %956 }
 0x119   : > { %v958_v60 = vunpack.i.l.bf16 %v957_v59  ;;  %v959_v12 = vunpack.i.h.bf16 %v957_v59 }
 0x11b   : > { %v398_v61 = vsel %vm316_vm1, %v1124_v25, %v958_v60  ;;  %v401_v13 = vsel %vm316_vm1, %v1127_v27, %v959_v12 }
 0x11c   : > { %442 = vmatmul.f32.vlgmr.msrb.gmra.mxu0 %v398_v61 }
 0x136   : > { %v383_v62 = vpop.permute.xlu0 %382 }
 0x137   : > { %v402_v63 = vsel %vm316_vm1, %v1134_v33, %v383_v62 }
 0x138   : > { %454 = vmatmul.f32.vlgmr.msra.gmra.mxu2 %v402_v63 }
 0x13e   : > { %v385_v0 = vpop.permute.xlu0 %384 }
 0x13f   : > { %v403_v1 = vsel %vm316_vm1, %v1142_v39, %v385_v0 }
 0x140   : > { %457 = vmatmul.f32.gmra.mxu2 %v403_v1 }
 0x148   : > { %v947_v2 = vpop.permute.xlu1 %946 }
 0x149   : > { %v949_v3 = vunpack.i.h.bf16 %v947_v2  ;;  %v948_v4 = vunpack.i.l.bf16 %v947_v2 }
 0x14b   : > { %v399_v5 = vsel %vm316_vm1, %v340_v44, %v948_v4  ;;  %v404_v6 = vsel %vm316_vm1, %v353_v46, %v949_v3 }
 0x14c   : > { %445 = vmatmul.f32.vlgmr.msra.gmra.mxu1 %v399_v5  ;;  %460 = vmatmul.f32.gmra.mxu2 %v404_v6 }
 0x150   : > { %v952_v7 = vpop.permute.xlu1 %951 }
 0x151   : > { %v954_v8 = vunpack.i.h.bf16 %v952_v7  ;;  %v953_v9 = vunpack.i.l.bf16 %v952_v7 }
 0x153   : > { %v400_v10 = vsel %vm316_vm1, %v1122_v24, %v953_v9  ;;  %v405_v11 = vsel %vm316_vm1, %v355_v53, %v954_v8 }
 0x154   : > { %448 = vmatmul.f32.gmra.mxu1 %v400_v10  ;;  %463 = vmatmul.f32.gmra.mxu2 %v405_v11 }
 0x15c   : > { %451 = vmatmul.f32.gmra.mxu1 %v401_v13 }
 0x199   : > { %v443_v15 = vpop.f32.mrf.mxu0 }
 0x19a   : > { %v444_v16 = vadd.f32 %v960_v14, %v443_v15 }
 0x19c   : > { %vm467_vm2 = vcmp.gt.f32.partialorder %v444_v16, 0.0  ;;  %v475_v17 = vmul.f32 0.2, %v444_v16 }
 0x19e   : > { %v1181_v18 = vsel %vm467_vm2, %v444_v16, %v475_v17 }
 0x19f   : > { %v501_v19 = vmul.f32 %v1181_v18, %v1181_v18  ;;  %493 = vst.msk [vmem:[%s1185_s21] sm:$0xff] %vm316_vm1, %v1181_v18 }
 0x1a1   : > { %v509_v20 = vsel %vm316_vm1, %v501_v19, 0.0 }
 0x1a2   : > { %510 = vadd.xlane.f32.xlu2 %v509_v20 }
 0x1bb   : > { %v455_v21 = vpop.f32.mrf.mxu2 }
 0x1bc   : > { %v456_v22 = vadd.f32 %v960_v14, %v455_v21 }
 0x1be   : > { %vm471_vm3 = vcmp.gt.f32.partialorder %v456_v22, 0.0  ;;  %v479_v23 = vmul.f32 0.2, %v456_v22 }
 0x1c0   : > { %v1191_v24 = vsel %vm471_vm3, %v456_v22, %v479_v23 }
 0x1c1   : > { %497 = vst.msk [vmem:[%s1185_s21 + $0x20] sm:$0xff] %vm316_vm1, %v1191_v24  ;;  %v505_v59 = vmul.f32 %v1191_v24, %v1191_v24 }
 0x1c3   : > { %v458_v25 = vpop.f32.mrf.mxu2  ;;  %v521_v60 = vsel %vm316_vm1, %v505_v59, 0.0 }
 0x1c4   : > { %v459_v26 = vadd.f32 %v960_v14, %v458_v25 }
 0x1c6   : > { %vm472_vm4 = vcmp.gt.f32.partialorder %v459_v26, 0.0  ;;  %v480_v27 = vmul.f32 0.2, %v459_v26 }
 0x1c8   : > { %v1196_v28 = vsel %vm472_vm4, %v459_v26, %v480_v27 }
 0x1c9   : > { %v446_v29 = vpop.f32.mrf.mxu1  ;;  %498 = vst.msk [vmem:[%s1185_s21 + $0x28] sm:$0xff] %vm316_vm1, %v1196_v28  ;;  %v506_v42 = vmul.f32 %v1196_v28, %v1196_v28 }
 0x1ca   : > { %v447_v30 = vadd.f32 %v960_v14, %v446_v29 }
 0x1cb   : > { %v524_v49 = vsel %vm316_vm1, %v506_v42, 0.0 }
 0x1cc   : > { %vm468_vm5 = vcmp.gt.f32.partialorder %v447_v30, 0.0  ;;  %v476_v31 = vmul.f32 0.2, %v447_v30 }
 0x1ce   : > { %v1201_v32 = vsel %vm468_vm5, %v447_v30, %v476_v31 }
 0x1cf   : > { %v461_v33 = vpop.f32.mrf.mxu2  ;;  %v502_v34 = vmul.f32 %v1201_v32, %v1201_v32  ;;  %494 = vst.msk [vmem:[%s1185_s21 + $0x8] sm:$0xff] %vm316_vm1, %v1201_v32 }
 0x1d0   : > { %v462_v35 = vadd.f32 %v960_v14, %v461_v33 }
 0x1d1   : > { %v449_v36 = vpop.f32.mrf.mxu1  ;;  %v512_v37 = vsel %vm316_vm1, %v502_v34, 0.0 }
 0x1d2   : > { %vm473_vm6 = vcmp.gt.f32.partialorder %v462_v35, 0.0  ;;  %v481_v38 = vmul.f32 0.2, %v462_v35  ;;  %v450_v39 = vadd.f32 %v960_v14, %v449_v36  ;;  %513 = vadd.xlane.f32.xlu0 %v512_v37 }
 0x1d4   : > { %vm469_vm7 = vcmp.gt.f32.partialorder %v450_v39, 0.0  ;;  %v477_v40 = vmul.f32 0.2, %v450_v39  ;;  %v1209_v41 = vsel %vm473_vm6, %v462_v35, %v481_v38 }
 0x1d5   : > { %499 = vst.msk [vmem:[%s1185_s21 + $0x30] sm:$0xff] %vm316_vm1, %v1209_v41  ;;  %v507_v54 = vmul.f32 %v1209_v41, %v1209_v41 }
 0x1d6   : > { %v1216_v43 = vsel %vm469_vm7, %v450_v39, %v477_v40 }
 0x1d7   : > { %v464_v44 = vpop.f32.mrf.mxu2  ;;  %v503_v45 = vmul.f32 %v1216_v43, %v1216_v43  ;;  %495 = vst.msk [vmem:[%s1185_s21 + $0x10] sm:$0xff] %vm316_vm1, %v1216_v43  ;;  %v527_v58 = vsel %vm316_vm1, %v507_v54, 0.0 }
 0x1d8   : > { %v465_v46 = vadd.f32 %v960_v14, %v464_v44 }
 0x1d9   : > { %v452_v47 = vpop.f32.mrf.mxu1  ;;  %v515_v48 = vsel %vm316_vm1, %v503_v45, 0.0 }
 0x1da   : > { %vm474_vm8 = vcmp.gt.f32.partialorder %v465_v46, 0.0  ;;  %v482_v50 = vmul.f32 0.2, %v465_v46  ;;  %v453_v51 = vadd.f32 %v960_v14, %v452_v47  ;;  %516 = vadd.xlane.f32.xlu1 %v515_v48  ;;  %525 = vadd.xlane.f32.xlu0 %v524_v49 }
 0x1dc   : > { %vm470_vm9 = vcmp.gt.f32.partialorder %v453_v51, 0.0  ;;  %v478_v52 = vmul.f32 0.2, %v453_v51  ;;  %v1225_v53 = vsel %vm474_vm8, %v465_v46, %v482_v50 }
 0x1dd   : > { %500 = vst.msk [vmem:[%s1185_s21 + $0x38] sm:$0xff] %vm316_vm1, %v1225_v53  ;;  %v508_v61 = vmul.f32 %v1225_v53, %v1225_v53 }
 0x1de   : > { %v1232_v55 = vsel %vm470_vm9, %v453_v51, %v478_v52 }
 0x1df   : > { %v504_v56 = vmul.f32 %v1232_v55, %v1232_v55  ;;  %496 = vst.msk [vmem:[%s1185_s21 + $0x18] sm:$0xff] %vm316_vm1, %v1232_v55  ;;  %v530_v62 = vsel %vm316_vm1, %v508_v61, 0.0 }
 0x1e1   : > { %v518_v57 = vsel %vm316_vm1, %v504_v56, 0.0 }
 0x1e2   : > { %519 = vadd.xlane.f32.xlu2 %v518_v57  ;;  %528 = vadd.xlane.f32.xlu1 %v527_v58 }
 0x1ea   : > { %522 = vadd.xlane.f32.xlu2 %v521_v60 }
 0x1f2   : > { %531 = vadd.xlane.f32.xlu2 %v530_v62 }
 0x215   : > { %v511_v63 = vpop.xlane.xlu2 %510 }
 0x216   : > { %v533_v0 = vmax.f32 %v511_v63, 1e-24 }
 0x218   : > { %961 = vrsqrt.f32 %v533_v0  ;;  %vm547_vm11 = vweird.f32 %v533_v0 }
 0x21e   : > { %v962_v1 = vpop.eup %961 }
 0x21f   : > { %v542_v2 = vmul.f32 %v962_v1, %v533_v0  ;;  %vm548_vm10 = vweird.f32 %v962_v1 }
 0x220   : > { %vm549_vm12 = vmor %vm547_vm11, %vm548_vm10 }
 0x221   : > { %v543_v3 = vmul.f32 %v962_v1, %v542_v2 }
 0x223   : > { %v544_v4 = vmul.f32 0.5, %v543_v3 }
 0x225   : > { %v545_v5 = vsub.f32 1.5, %v544_v4 }
 0x227   : > { %v546_v6 = vmul.f32 %v962_v1, %v545_v5 }
 0x229   : > { %v550_v7 = vsel %vm549_vm12, %v962_v1, %v546_v6 }
 0x22a   : > { %v1248_v8 = vmul.f32 %v550_v7, %v1181_v18 }
 0x245   : > { %v514_v9 = vpop.xlane.xlu0 %513 }
 0x246   : > { %v534_v10 = vmax.f32 %v514_v9, 1e-24 }
 0x248   : > { %963 = vrsqrt.f32 %v534_v10  ;;  %vm557_vm14 = vweird.f32 %v534_v10 }
 0x24d   : > { %v517_v11 = vpop.xlane.xlu1 %516  ;;  %v526_v12 = vpop.xlane.xlu0 %525 }
 0x24e   : > { %v964_v13 = vpop.eup %963  ;;  %v535_v14 = vmax.f32 %v517_v11, 1e-24  ;;  %v538_v15 = vmax.f32 %v526_v12, 1e-24 }
 0x24f   : > { %v552_v16 = vmul.f32 %v964_v13, %v534_v10  ;;  %vm558_vm13 = vweird.f32 %v964_v13 }
 0x250   : > { %965 = vrsqrt.f32 %v535_v14  ;;  %vm559_vm15 = vmor %vm557_vm14, %vm558_vm13  ;;  %vm567_vm3 = vweird.f32 %v535_v14  ;;  %vm597_vm5 = vweird.f32 %v538_v15 }
 0x251   : > { %v553_v17 = vmul.f32 %v964_v13, %v552_v16  ;;  %967 = vrsqrt.f32 %v538_v15 }
 0x253   : > { %v554_v19 = vmul.f32 0.5, %v553_v17 }
 0x255   : > { %v555_v20 = vsub.f32 1.5, %v554_v19  ;;  %v520_v21 = vpop.xlane.xlu2 %519  ;;  %v529_v22 = vpop.xlane.xlu1 %528 }
 0x256   : > { %v966_v23 = vpop.eup %965  ;;  %v536_v18 = vmax.f32 %v520_v21, 1e-24  ;;  %v539_v25 = vmax.f32 %v529_v22, 1e-24 }
 0x257   : > { %v968_v26 = vpop.eup %967  ;;  %v556_v27 = vmul.f32 %v964_v13, %v555_v20  ;;  %v562_v29 = vmul.f32 %v966_v23, %v535_v14  ;;  %vm568_vm0 = vweird.f32 %v966_v23 }
 0x258   : > { %v592_v30 = vmul.f32 %v968_v26, %v538_v15  ;;  %969 = vrsqrt.f32 %v536_v18  ;;  %vm598_vm2 = vweird.f32 %v968_v26  ;;  %vm569_vm4 = vmor %vm567_vm3, %vm568_vm0  ;;  %vm577_vm9 = vweird.f32 %v536_v18 }
 0x259   : > { %v560_v31 = vsel %vm559_vm15, %v964_v13, %v556_v27  ;;  %v563_v33 = vmul.f32 %v966_v23, %v562_v29  ;;  %971 = vrsqrt.f32 %v539_v25  ;;  %vm599_vm6 = vmor %vm597_vm5, %vm598_vm2  ;;  %vm607_vm11 = vweird.f32 %v539_v25 }
 0x25a   : > { %v1251_v34 = vmul.f32 %v560_v31, %v1201_v32  ;;  %v593_v35 = vmul.f32 %v968_v26, %v592_v30 }
 0x25b   : > { %v564_v36 = vmul.f32 0.5, %v563_v33 }
 0x25c   : > { %v594_v37 = vmul.f32 0.5, %v593_v35 }
 0x25d   : > { %v565_v38 = vsub.f32 1.5, %v564_v36  ;;  %v523_v39 = vpop.xlane.xlu2 %522 }
 0x25e   : > { %v970_v40 = vpop.eup %969  ;;  %v595_v42 = vsub.f32 1.5, %v594_v37  ;;  %v537_v44 = vmax.f32 %v523_v39, 1e-24 }
 0x25f   : > { %v972_v45 = vpop.eup %971  ;;  %v566_v46 = vmul.f32 %v966_v23, %v565_v38  ;;  %v572_v47 = vmul.f32 %v970_v40, %v536_v18  ;;  %vm578_vm7 = vweird.f32 %v970_v40 }
 0x260   : > { %v596_v48 = vmul.f32 %v968_v26, %v595_v42  ;;  %v602_v49 = vmul.f32 %v972_v45, %v539_v25  ;;  %973 = vrsqrt.f32 %v537_v44  ;;  %vm608_vm8 = vweird.f32 %v972_v45  ;;  %vm579_vm10 = vmor %vm577_vm9, %vm578_vm7 }
 0x261   : > { %v570_v32 = vsel %vm569_vm4, %v966_v23, %v566_v46  ;;  %v573_v50 = vmul.f32 %v970_v40, %v572_v47  ;;  %vm609_vm12 = vmor %vm607_vm11, %vm608_vm8  ;;  %vm587_vm14 = vweird.f32 %v537_v44 }
 0x262   : > { %v1254_v51 = vmul.f32 %v570_v32, %v1216_v43  ;;  %v600_v52 = vsel %vm599_vm6, %v968_v26, %v596_v48  ;;  %v603_v54 = vmul.f32 %v972_v45, %v602_v49 }
 0x263   : > { %v1257_v56 = vmul.f32 %v600_v52, %v1196_v28  ;;  %v574_v57 = vmul.f32 0.5, %v573_v50 }
 0x264   : > { %v604_v58 = vmul.f32 0.5, %v603_v54 }
 0x265   : > { %v575_v59 = vsub.f32 1.5, %v574_v57  ;;  %v532_v60 = vpop.xlane.xlu2 %531 }
 0x266   : > { %v974_v61 = vpop.eup %973  ;;  %v605_v62 = vsub.f32 1.5, %v604_v58  ;;  %v540_v63 = vmax.f32 %v532_v60, 1e-24 }
 0x267   : > { %v576_v0 = vmul.f32 %v970_v40, %v575_v59  ;;  %v582_v1 = vmul.f32 %v974_v61, %v537_v44  ;;  %vm588_vm13 = vweird.f32 %v974_v61 }
 0x268   : > { %v606_v43 = vmul.f32 %v972_v45, %v605_v62  ;;  %975 = vrsqrt.f32 %v540_v63  ;;  %vm589_vm15 = vmor %vm587_vm14, %vm588_vm13  ;;  %vm617_vm2 = vweird.f32 %v540_v63 }
 0x269   : > { %v580_v2 = vsel %vm579_vm10, %v970_v40, %v576_v0  ;;  %v583_v28 = vmul.f32 %v974_v61, %v582_v1 }
 0x26a   : > { %v1260_v3 = vmul.f32 %v580_v2, %v1232_v55  ;;  %v610_v4 = vsel %vm609_vm12, %v972_v45, %v606_v43 }
 0x26b   : > { %v1263_v5 = vmul.f32 %v610_v4, %v1209_v41  ;;  %v584_v6 = vmul.f32 0.5, %v583_v28 }
 0x26d   : > { %v585_v7 = vsub.f32 1.5, %v584_v6 }
 0x26e   : > { %v976_v9 = vpop.eup %975 }
 0x26f   : > { %v586_v10 = vmul.f32 %v974_v61, %v585_v7  ;;  %v612_v11 = vmul.f32 %v976_v9, %v540_v63  ;;  %vm618_vm0 = vweird.f32 %v976_v9 }
 0x270   : > { %vm619_vm3 = vmor %vm617_vm2, %vm618_vm0 }
 0x271   : > { %v590_v12 = vsel %vm589_vm15, %v974_v61, %v586_v10  ;;  %v613_v13 = vmul.f32 %v976_v9, %v612_v11 }
 0x272   : > { %v1266_v14 = vmul.f32 %v590_v12, %v1191_v24 }
 0x273   : > { %v614_v15 = vmul.f32 0.5, %v613_v13 }
 0x275   : > { %v615_v55 = vsub.f32 1.5, %v614_v15 }
 0x276   : > { %631 = sbr.rel (%p871_p7) target bundleno = 769 (0x301), region = 44 }
 0x277   : > { %v616_v16 = vmul.f32 %v976_v9, %v615_v55 }
 0x279   : > { %v620_v41 = vsel %vm619_vm3, %v976_v9, %v616_v16 }
 0x27a   : > { %v1269_v17 = vmul.f32 %v620_v41, %v1225_v53 }
 0x27b   : > { %653 = vrot.lane.b32.xlu1 %v1254_v51, %s1002_s19  ;;  %649 = vrot.lane.b32.xlu0 %v1248_v8, %s1002_s19  ;;  %v637_v24 = vld [vmem:[%s1428_s1 + $0x20] sm:$0xff]  ;;  %v638_v20 = vld [vmem:[%s1428_s1 + $0x28] sm:$0xff] }
 0x27c   : > { %657 = vrot.lane.b32.xlu2 %v1266_v14, %s1002_s19  ;;  %v635_v23 = vld [vmem:[%s1428_s1 + $0x10] sm:$0xff]  ;;  %v633_v18 = vld [vmem:[%s1428_s1] sm:$0xff]  ;;  %v636_v30 = vld [vmem:[%s1428_s1 + $0x18] sm:$0xff] }
 0x27d   : > { %v634_v31 = vld [vmem:[%s1428_s1 + $0x8] sm:$0xff]  ;;  %v640_v38 = vld [vmem:[%s1428_s1 + $0x38] sm:$0xff]  ;;  %v639_v39 = vld [vmem:[%s1428_s1 + $0x30] sm:$0xff] }
 0x283   : > { %655 = vrot.lane.b32.xlu1 %v1260_v3, %s1002_s19  ;;  %651 = vrot.lane.b32.xlu0 %v1251_v34, %s1002_s19 }
 0x284   : > { %659 = vrot.lane.b32.xlu2 %v1257_v56, %s1002_s19 }
 0x28b   : > { %663 = vrot.lane.b32.xlu1 %v1269_v17, %s1002_s19  ;;  %661 = vrot.lane.b32.xlu0 %v1263_v5, %s1002_s19 }
 0x2d6   : > { %v658_v53 = vpop.permute.xlu2 %657 }
 0x2d7   : > { %v677_v19 = vsel %vm316_vm1, %v637_v24, %v658_v53 }
 0x2d8   : > { %690 = vst [vmem:[%s1431_s4 + $0x40] sm:$0xff] %v677_v19 }
 0x2de   : > { %v660_v21 = vpop.permute.xlu2 %659 }
 0x2df   : > { %v678_v22 = vsel %vm316_vm1, %v638_v20, %v660_v21 }
 0x2e0   : > { %691 = vst [vmem:[%s1431_s4 + $0x50] sm:$0xff] %v678_v22 }
 0x2ed   : > { %v654_v25 = vpop.permute.xlu1 %653  ;;  %v650_v26 = vpop.permute.xlu0 %649 }
 0x2ee   : > { %v675_v27 = vsel %vm316_vm1, %v635_v23, %v654_v25  ;;  %v673_v29 = vsel %vm316_vm1, %v633_v18, %v650_v26 }
 0x2ef   : > { %688 = vst [vmem:[%s1431_s4 + $0x20] sm:$0xff] %v675_v27 }
 0x2f0   : > { %686 = vst [vmem:[%s1431_s4] sm:$0xff] %v673_v29 }
 0x2f5   : > { %v656_v33 = vpop.permute.xlu1 %655  ;;  %v652_v35 = vpop.permute.xlu0 %651 }
 0x2f6   : > { %v676_v36 = vsel %vm316_vm1, %v636_v30, %v656_v33  ;;  %v674_v37 = vsel %vm316_vm1, %v634_v31, %v652_v35 }
 0x2f7   : > { %689 = vst [vmem:[%s1431_s4 + $0x30] sm:$0xff] %v676_v36 }
 0x2f8   : > { %687 = vst [vmem:[%s1431_s4 + $0x10] sm:$0xff] %v674_v37 }
 0x2fd   : > { %v664_v40 = vpop.permute.xlu1 %663  ;;  %v662_v42 = vpop.permute.xlu0 %661 }
 0x2fe   : > { %v680_v44 = vsel %vm316_vm1, %v640_v38, %v664_v40  ;;  %v679_v45 = vsel %vm316_vm1, %v639_v39, %v662_v42 }
 0x2ff   : > { %693 = vst [vmem:[%s1431_s4 + $0x70] sm:$0xff] %v680_v44 }
 0x300   : > { %692 = vst [vmem:[%s1431_s4 + $0x60] sm:$0xff] %v679_v45 }
 0x301 PF: > { %p872_p8 = scmp.ne.s32.totalorder %s991_s15, 1 }
 0x303   : > { %697 = sbr.rel (%p872_p8) target bundleno = 784 (0x310), region = 48 }
 0x308   : > { %703 = vst.msk [vmem:[%s1431_s4 + $0x8] sm:$0xff] %vm316_vm1, %v1248_v8 }
 0x309   : > { %704 = vst.msk [vmem:[%s1431_s4 + $0x18] sm:$0xff] %vm316_vm1, %v1251_v34 }
 0x30a   : > { %705 = vst.msk [vmem:[%s1431_s4 + $0x28] sm:$0xff] %vm316_vm1, %v1254_v51 }
 0x30b   : > { %706 = vst.msk [vmem:[%s1431_s4 + $0x38] sm:$0xff] %vm316_vm1, %v1260_v3 }
 0x30c   : > { %707 = vst.msk [vmem:[%s1431_s4 + $0x48] sm:$0xff] %vm316_vm1, %v1266_v14 }
 0x30d   : > { %708 = vst.msk [vmem:[%s1431_s4 + $0x58] sm:$0xff] %vm316_vm1, %v1257_v56 }
 0x30e   : > { %709 = vst.msk [vmem:[%s1431_s4 + $0x68] sm:$0xff] %vm316_vm1, %v1263_v5 }
 0x30f   : > { %710 = vst.msk [vmem:[%s1431_s4 + $0x78] sm:$0xff] %vm316_vm1, %v1269_v17 }
 0x310 PF: > { %p873_p9 = scmp.ne.s32.totalorder %s991_s15, 2 }
 0x311   : > { %s1003_s27 = smov (!%p873_p9), 64  }
 0x312   : > { %714 = sbr.rel (%p873_p9) target bundleno = 924 (0x39c), region = 52 }
 0x317   : > { %727 = vrot.lane.b32.xlu1 %v1254_v51, %s1003_s27  ;;  %723 = vrot.lane.b32.xlu0 %v1248_v8, %s1003_s27  ;;  %vm752_vm1 = vcmask 1048064  }
 0x318   : > { %731 = vrot.lane.b32.xlu2 %v1266_v14, %s1003_s27 }
 0x31f   : > { %729 = vrot.lane.b32.xlu1 %v1260_v3, %s1003_s27  ;;  %725 = vrot.lane.b32.xlu0 %v1251_v34, %s1003_s27 }
 0x320   : > { %733 = vrot.lane.b32.xlu2 %v1257_v56, %s1003_s27 }
 0x327   : > { %737 = vrot.lane.b32.xlu1 %v1269_v17, %s1003_s27  ;;  %735 = vrot.lane.b32.xlu0 %v1263_v5, %s1003_s27 }
 0x372   : > { %v732_v46 = vpop.permute.xlu2 %731 }
 0x373   : > { %757 = vst.msk [vmem:[%s1431_s4 + $0x48] sm:$0xff] %vm752_vm1, %v732_v46 }
 0x37a   : > { %v734_v8 = vpop.permute.xlu2 %733 }
 0x37b   : > { %758 = vst.msk [vmem:[%s1431_s4 + $0x58] sm:$0xff] %vm752_vm1, %v734_v8 }
 0x389   : > { %v728_v34 = vpop.permute.xlu1 %727  ;;  %v724_v47 = vpop.permute.xlu0 %723 }
 0x38a   : > { %755 = vst.msk [vmem:[%s1431_s4 + $0x28] sm:$0xff] %vm752_vm1, %v728_v34 }
 0x38b   : > { %753 = vst.msk [vmem:[%s1431_s4 + $0x8] sm:$0xff] %vm752_vm1, %v724_v47 }
 0x391   : > { %v730_v48 = vpop.permute.xlu1 %729  ;;  %v726_v49 = vpop.permute.xlu0 %725 }
 0x392   : > { %756 = vst.msk [vmem:[%s1431_s4 + $0x38] sm:$0xff] %vm752_vm1, %v730_v48 }
 0x393   : > { %754 = vst.msk [vmem:[%s1431_s4 + $0x18] sm:$0xff] %vm752_vm1, %v726_v49 }
 0x399   : > { %v738_v32 = vpop.permute.xlu1 %737  ;;  %v736_v50 = vpop.permute.xlu0 %735 }
 0x39a   : > { %760 = vst.msk [vmem:[%s1431_s4 + $0x78] sm:$0xff] %vm752_vm1, %v738_v32 }
 0x39b   : > { %759 = vst.msk [vmem:[%s1431_s4 + $0x68] sm:$0xff] %vm752_vm1, %v736_v50 }
 0x39c PF: > { %s14_s17 = sadd.s32 1, %s999_s17   ;;  %s1432_s15 = smov %s995_s16 }
 0x39d   : > { %p11_p10 = scmp.ge.s32.totalorder %s14_s17, 5   ;;  %s1433_s16 = smov %s1435_s18 }
 0x39f   :  { %13 = sbr.rel (!%p11_p10) target bundleno = 2 (0x2), region = 91 }

</bundles_post_ra>
